<compile_context>
chip_gen: v7x
topology: tpu7x:2x2x1
jax: 0.10.0
libtpu: 0.0.40
codegen_flags: <defaults>
</compile_context>

<pallas_src>
import jax
import jax.numpy as jnp
from jax import lax
from jax.experimental import pallas as pl
from jax.experimental.pallas import tpu as pltpu


# ----------------------------------------------------------------------------
# Fused Pallas kernel
# ----------------------------------------------------------------------------
def _make_up_kernel(H2, W2, Cin, Cmid_p):
    HW = H2 * W2
    # Zero apron on the flattened spatial axis.  Must cover the largest tap
    # offset (W2 + 1); kept at 128 so the center piece stays lane-aligned.
    PADL = 128
    assert PADL >= W2 + 1

    def _conv3x3_bias_relu(x, w_ref, b_ref, left, right, cin):
        # x: (cin, HW) bf16, w_ref: (cout, 9*cin) bf16 (BN scale pre-folded),
        # b_ref: (cout, 1) f32, left/right: (1, HW) bool column-edge masks.
        zpad = jnp.zeros((cin, PADL), jnp.bfloat16)
        xz = jnp.concatenate([zpad, x, zpad], axis=1)        # (cin, HW + 2*PADL)
        zero = jnp.zeros((), jnp.bfloat16)
        pieces = []
        for dy in (-1, 0, 1):
            for dx in (-1, 0, 1):
                off = dy * W2 + dx                           # static tap offset
                p = xz[:, PADL + off:PADL + off + HW]
                if dx == -1:   # shifted read wraps from previous row at x == 0
                    p = jnp.where(left, zero, p)
                elif dx == 1:  # wraps from next row at x == W2 - 1
                    p = jnp.where(right, zero, p)
                pieces.append(p)
        patches = jnp.concatenate(pieces, axis=0)            # (9*cin, HW) bf16
        y = jnp.dot(w_ref[...], patches,
                    preferred_element_type=jnp.float32)      # (cout, HW) f32
        return jnp.maximum(y + b_ref[...], 0.0)              # folded-BN bias+ReLU

    def kernel(x1_ref, x2_ref, kron_ref, w1_ref, b1_ref, w2_ref, b2_ref, o_ref):
        # dx-boundary lane masks, built in-kernel (no HBM mask operands).
        col = lax.broadcasted_iota(jnp.int32, (1, HW), 1) % W2
        left = col == 0
        right = col == W2 - 1
        # Bilinear x2 upsample (+ zero pad to the skip's spatial size) for all
        # channels at once as one matmul: (C1, H1*W1) @ (H1*W1, HW).
        up = jnp.dot(x1_ref[0], kron_ref[...],
                     preferred_element_type=jnp.float32)     # (C1, HW) f32
        # Channel concat [x2, upsampled(x1)] -> (Cin, HW), bf16 for the MXU.
        x = jnp.concatenate([x2_ref[0], up.astype(jnp.bfloat16)], axis=0)
        h = _conv3x3_bias_relu(x, w1_ref, b1_ref, left, right, Cin)    # (Cmid_p, HW)
        o_ref[0] = _conv3x3_bias_relu(h.astype(jnp.bfloat16), w2_ref, b2_ref,
                                      left, right, Cmid_p)             # (Cout, HW)

    return kernel


# ----------------------------------------------------------------------------
# Host-side helpers (tiny parameter prep, folded into constants under jit)
# ----------------------------------------------------------------------------
def _interp_matrix(out_size, in_size):
    """Linear-interp matrix for nn.Upsample(mode='bilinear', align_corners=True)."""
    if in_size == 1:
        return jnp.ones((out_size, 1), jnp.float32)
    src = jnp.arange(out_size, dtype=jnp.float32) * (in_size - 1) / (out_size - 1)
    lo = jnp.floor(src).astype(jnp.int32)
    hi = jnp.minimum(lo + 1, in_size - 1)
    frac = src - lo.astype(jnp.float32)
    rows = jnp.arange(out_size)
    m = jnp.zeros((out_size, in_size), jnp.float32)
    m = m.at[rows, lo].add(1.0 - frac)
    m = m.at[rows, hi].add(frac)
    return m


def _upsample_pad_matrix(n_in, n_out):
    """(n_out, n_in): x2 align_corners=True upsample, then zero-pad to n_out."""
    up = _interp_matrix(2 * n_in, n_in)
    lo = (n_out - 2 * n_in) // 2
    return jnp.zeros((n_out, n_in), jnp.float32).at[lo:lo + 2 * n_in].set(up)


def up_forward(params, x1, x2):
    """Up.forward(x1, x2): upsample x1, pad to x2, concat channels, DoubleC."""
    N, C1, H1, W1 = x1.shape
    _, C2, H2, W2 = x2.shape
    HW = H2 * W2
    Cin = C1 + C2
    Cmid = params["w1"].shape[-1]
    Cout = params["w2"].shape[-1]
    Cmid_p = ((Cmid + 7) // 8) * 8      # pad conv2's Cin to an 8-sublane multiple

    # upsample+pad folded into one Kronecker matrix (transposed for x @ K), bf16.
    whp = _upsample_pad_matrix(H1, H2)                       # (H2, H1)
    wwp = _upsample_pad_matrix(W1, W2)                       # (W2, W1)
    kron_t = jnp.kron(whp, wwp).T.astype(jnp.bfloat16)       # (H1*W1, HW)

    # HWIO -> tap-major (cout, 9*cin) im2col weight matrices, BN scale folded in.
    w1m = params["w1"].reshape(9 * Cin, Cmid) * params["s1"][None, :]
    w1m = jnp.pad(w1m, ((0, 0), (0, Cmid_p - Cmid))).T.astype(jnp.bfloat16)
    b1 = jnp.pad(params["b1"], (0, Cmid_p - Cmid)).reshape(Cmid_p, 1)
    b1 = b1.astype(jnp.float32)

    w2p = jnp.pad(params["w2"], ((0, 0), (0, 0), (0, Cmid_p - Cmid), (0, 0)))
    w2m = (w2p.reshape(9 * Cmid_p, Cout) * params["s2"][None, :]).T
    w2m = w2m.astype(jnp.bfloat16)
    b2 = params["b2"].reshape(Cout, 1).astype(jnp.float32)

    x1f = x1.reshape(N, C1, H1 * W1).astype(jnp.bfloat16)
    x2f = x2.reshape(N, C2, HW).astype(jnp.bfloat16)

    operands = (x1f, x2f, kron_t, w1m, b1, w2m, b2)
    flops = 2 * N * HW * (C1 * H1 * W1 + Cmid_p * 9 * Cin + Cout * 9 * Cmid_p)
    bytes_accessed = sum(int(a.size) * a.dtype.itemsize for a in operands)
    bytes_accessed += N * Cout * HW * 4

    kernel = _make_up_kernel(H2, W2, Cin, Cmid_p)
    out = pl.pallas_call(
        kernel,
        out_shape=jax.ShapeDtypeStruct((N, Cout, HW), jnp.float32),
        grid=(N,),
        in_specs=[
            pl.BlockSpec((1, C1, H1 * W1), lambda n: (n, 0, 0)),
            pl.BlockSpec((1, C2, HW), lambda n: (n, 0, 0)),
            pl.BlockSpec((H1 * W1, HW), lambda n: (0, 0)),
            pl.BlockSpec((Cmid_p, 9 * Cin), lambda n: (0, 0)),
            pl.BlockSpec((Cmid_p, 1), lambda n: (0, 0)),
            pl.BlockSpec((Cout, 9 * Cmid_p), lambda n: (0, 0)),
            pl.BlockSpec((Cout, 1), lambda n: (0, 0)),
        ],
        out_specs=pl.BlockSpec((1, Cout, HW), lambda n: (n, 0, 0)),
        compiler_params=pltpu.CompilerParams(
            dimension_semantics=("parallel",)),
        cost_estimate=pl.CostEstimate(flops=flops, transcendentals=0,
                                      bytes_accessed=bytes_accessed),
    )(*operands)
    return out.reshape(N, Cout, H2, W2)


# ----------------------------------------------------------------------------
# Parameter init (PyTorch-equivalent layouts, BN folded to eval-mode scale/bias)
# ----------------------------------------------------------------------------
def _fold_bn(gamma, beta, running_mean, running_var, eps=1e-5):
    scale = gamma / jnp.sqrt(running_var + eps)
    bias = beta - running_mean * scale
    return scale, bias


def init_up_params(key, in_channels, out_channels):
    """Deterministic parameters for Up(in_channels, out_channels, bilinear=True)."""
    mid = in_channels // 2
    ks = jax.random.split(key, 10)

    def conv_w(k, cin, cout):
        # PyTorch layout (Cout, Cin, 3, 3) -> HWIO (3, 3, Cin, Cout)
        w = 0.1 * jax.random.normal(k, (cout, cin, 3, 3), jnp.float32)
        return jnp.transpose(w, (2, 3, 1, 0))

    def bn(kg, kb, km, kv, c):
        gamma = 0.5 + jax.random.uniform(kg, (c,), jnp.float32)
        beta = 0.1 * jax.random.normal(kb, (c,), jnp.float32)
        rmean = 0.1 * jax.random.normal(km, (c,), jnp.float32)
        rvar = 0.5 + jax.random.uniform(kv, (c,), jnp.float32)
        return _fold_bn(gamma, beta, rmean, rvar)

    w1 = conv_w(ks[0], in_channels, mid)
    s1, b1 = bn(ks[1], ks[2], ks[3], ks[4], mid)
    w2 = conv_w(ks[5], mid, out_channels)
    s2, b2 = bn(ks[6], ks[7], ks[8], ks[9], out_channels)
    return dict(w1=w1, s1=s1, b1=b1, w2=w2, s2=s2, b2=b2)


# ----------------------------------------------------------------------------
# Pure-JAX reference (f32, for verification)
# ----------------------------------------------------------------------------
def _ref_forward(params, x1, x2):
    N, C, H, W = x1.shape
    wh = _interp_matrix(2 * H, H)
    ww = _interp_matrix(2 * W, W)
    x1u = jnp.einsum("ah,nchw,bw->ncab", wh, x1, ww)
    diff_y = x2.shape[2] - x1u.shape[2]
    diff_x = x2.shape[3] - x1u.shape[3]
    x1p = jnp.pad(x1u, ((0, 0), (0, 0),
                        (diff_y // 2, diff_y - diff_y // 2),
                        (diff_x // 2, diff_x - diff_x // 2)))
    x = jnp.concatenate([x2, x1p], axis=1)
    x = jnp.transpose(x, (0, 2, 3, 1))

    def block(x, w, s, b):
        y = lax.conv_general_dilated(x, w, (1, 1), "SAME",
                                     dimension_numbers=("NHWC", "HWIO", "NHWC"))
        return jnp.maximum(y * s + b, 0.0)

    h = block(x, params["w1"], params["s1"], params["b1"])
    h = block(h, params["w2"], params["s2"], params["b2"])
    return jnp.transpose(h, (0, 3, 1, 2))


# ----------------------------------------------------------------------------
if __name__ == "__main__":
    key = jax.random.PRNGKey(0)
    k_x1, k_x2, k_p = jax.random.split(key, 3)

    # Up(in_channels=8, out_channels=4, bilinear=True):
    #   x1: (N, 4, 8, 8) low-res feature, x2: (N, 4, 16, 16) skip connection.
    in_channels, out_channels = 8, 4
    x1 = jax.random.normal(k_x1, (2, in_channels // 2, 8, 8), jnp.float32)
    x2 = jax.random.normal(k_x2, (2, in_channels // 2, 16, 16), jnp.float32)
    params = init_up_params(k_p, in_channels, out_channels)

    out = jax.jit(up_forward)(params, x1, x2)
    out = jax.block_until_ready(out)

    ref = _ref_forward(params, x1, x2)
    assert out.shape == (2, out_channels, 16, 16), out.shape
    # bf16 MXU inputs with f32 accumulation -> tolerance appropriate for bf16.
    assert jnp.allclose(out, ref, rtol=2e-2, atol=2e-2), float(
        jnp.max(jnp.abs(out - ref)))

    print("KERNEL_OK")
</pallas_src>

<mosaic_0001>
module attributes {stable_mosaic.version = 11 : i64} {
  func.func private @main(%arg0: i32) attributes {dimension_semantics = [#tpu.dimension_semantics<core_parallel>], iteration_bounds = array<i64: 2>, tpu.core_type = #tpu.core_type<sc_scalar_subcore>, window_params = []} {
    return
  }
}

module attributes {stable_mosaic.version = 11 : i64} {
  func.func private @main(%arg0: i32) attributes {dimension_semantics = [#tpu.dimension_semantics<core_parallel>], iteration_bounds = array<i64: 2>, tpu.core_type = #tpu.core_type<sc_scalar_subcore>, window_params = []} {
    return
  }
}

module attributes {stable_mosaic.version = 11 : i64} {
  func.func @kernel(%arg0: i32, %arg1: memref<1x4x64xbf16, #tpu.memory_space<vmem>>, %arg2: memref<1x4x256xbf16, #tpu.memory_space<vmem>>, %arg3: memref<64x256xbf16, #tpu.memory_space<vmem>>, %arg4: memref<8x72xbf16, #tpu.memory_space<vmem>>, %arg5: memref<8x1xf32, #tpu.memory_space<vmem>>, %arg6: memref<4x72xbf16, #tpu.memory_space<vmem>>, %arg7: memref<4x1xf32, #tpu.memory_space<vmem>>, %arg8: memref<1x4x256xf32, #tpu.memory_space<vmem>>) attributes {dimension_semantics = [#tpu.dimension_semantics<parallel>], iteration_bounds = array<i64: 2>, scalar_prefetch = 0 : i64, scratch_operands = 0 : i64, tpu.core_type = #tpu.core_type<tc>, window_params = [{transform_indices = @transform_0, window_bounds = array<i64: 1, 4, 64>}, {transform_indices = @transform_1, window_bounds = array<i64: 1, 4, 256>}, {pipeline_mode = #tpu.pipeline_mode<synchronous>, transform_indices = @transform_2, window_bounds = array<i64: 64, 256>}, {pipeline_mode = #tpu.pipeline_mode<synchronous>, transform_indices = @transform_3, window_bounds = array<i64: 8, 72>}, {pipeline_mode = #tpu.pipeline_mode<synchronous>, transform_indices = @transform_4, window_bounds = array<i64: 8, 1>}, {pipeline_mode = #tpu.pipeline_mode<synchronous>, transform_indices = @transform_5, window_bounds = array<i64: 4, 72>}, {pipeline_mode = #tpu.pipeline_mode<synchronous>, transform_indices = @transform_6, window_bounds = array<i64: 4, 1>}, {transform_indices = @transform_7, window_bounds = array<i64: 1, 4, 256>}]} {
    %0 = tpu.iota {dimensions = array<i32: 1>} : vector<1x256xi32>
    %c16_i32 = arith.constant 16 : i32
    %c0_i32 = arith.constant 0 : i32
    %1 = arith.cmpi eq, %c16_i32, %c0_i32 : i32
    %c1_i32 = arith.constant 1 : i32
    %2 = arith.select %1, %c1_i32, %c16_i32 : i32
    %3 = vector.broadcast %2 : i32 to vector<1x256xi32>
    %4 = arith.remsi %0, %3 : vector<1x256xi32>
    %c0_i32_0 = arith.constant 0 : i32
    %5 = vector.broadcast %c0_i32_0 : i32 to vector<1x256xi32>
    %6 = arith.cmpi ne, %4, %5 : vector<1x256xi32>
    %c0_i32_1 = arith.constant 0 : i32
    %7 = vector.broadcast %c0_i32_1 : i32 to vector<1x256xi32>
    %8 = arith.cmpi slt, %4, %7 : vector<1x256xi32>
    %c0_i32_2 = arith.constant 0 : i32
    %9 = arith.cmpi slt, %2, %c0_i32_2 : i32
    %10 = vector.broadcast %9 : i1 to vector<1x256xi1>
    %11 = vector.broadcast %10 : vector<1x256xi1> to vector<1x256xi1>
    %12 = arith.xori %8, %11 : vector<1x256xi1>
    %13 = arith.andi %12, %6 : vector<1x256xi1>
    %14 = vector.broadcast %2 : i32 to vector<1x256xi32>
    %15 = arith.addi %4, %14 : vector<1x256xi32>
    %16 = arith.select %13, %15, %4 : vector<1x256xi1>, vector<1x256xi32>
    %c0_i32_3 = arith.constant 0 : i32
    %17 = vector.broadcast %c0_i32_3 : i32 to vector<1x256xi32>
    %18 = arith.cmpi eq, %16, %17 : vector<1x256xi32>
    %c15_i32 = arith.constant 15 : i32
    %19 = vector.broadcast %c15_i32 : i32 to vector<1x256xi32>
    %20 = arith.cmpi eq, %16, %19 : vector<1x256xi32>
    %c0 = arith.constant 0 : index
    %c0_4 = arith.constant 0 : index
    %c0_5 = arith.constant 0 : index
    %21 = vector.load %arg1[%c0, %c0_4, %c0_5] : memref<1x4x64xbf16, #tpu.memory_space<vmem>>, vector<1x4x64xbf16>
    %22 = vector.shape_cast %21 : vector<1x4x64xbf16> to vector<4x64xbf16>
    %c0_6 = arith.constant 0 : index
    %c0_7 = arith.constant 0 : index
    %23 = vector.load %arg3[%c0_6, %c0_7] : memref<64x256xbf16, #tpu.memory_space<vmem>>, vector<64x256xbf16>
    %cst = arith.constant dense<0.000000e+00> : vector<4x256xf32>
    %24 = tpu.matmul %22, %23, %cst {dimension_numbers = #tpu.dot_dimension_numbers<[1], [0], [0], [1], [0, 0, 1, 1], [], []>} : vector<4x64xbf16>, vector<64x256xbf16>, vector<4x256xf32> -> vector<4x256xf32>
    %c0_8 = arith.constant 0 : index
    %c0_9 = arith.constant 0 : index
    %c0_10 = arith.constant 0 : index
    %25 = vector.load %arg2[%c0_8, %c0_9, %c0_10] : memref<1x4x256xbf16, #tpu.memory_space<vmem>>, vector<1x4x256xbf16>
    %26 = vector.shape_cast %25 : vector<1x4x256xbf16> to vector<4x256xbf16>
    %27 = arith.truncf %24 : vector<4x256xf32> to vector<4x256xbf16>
    %28 = tpu.concatenate %26, %27 in 0 : vector<4x256xbf16>, vector<4x256xbf16> -> vector<8x256xbf16>
    %cst_11 = arith.constant 0.000000e+00 : bf16
    %29 = vector.broadcast %cst_11 : bf16 to vector<8x128xbf16>
    %30 = tpu.concatenate %29, %28, %29 in 1 : vector<8x128xbf16>, vector<8x256xbf16>, vector<8x128xbf16> -> vector<8x512xbf16>
    %31 = vector.extract_strided_slice %30 {offsets = [0, 111], sizes = [8, 256], strides = [1, 1]} : vector<8x512xbf16> to vector<8x256xbf16>
    %cst_12 = arith.constant 0.000000e+00 : bf16
    %32 = vector.shape_cast %18 : vector<1x256xi1> to vector<1x256xi1>
    %33 = vector.broadcast %32 : vector<1x256xi1> to vector<8x256xi1>
    %34 = vector.broadcast %cst_12 : bf16 to vector<8x256xbf16>
    %35 = arith.select %33, %34, %31 : vector<8x256xi1>, vector<8x256xbf16>
    %36 = vector.extract_strided_slice %30 {offsets = [0, 112], sizes = [8, 256], strides = [1, 1]} : vector<8x512xbf16> to vector<8x256xbf16>
    %37 = vector.extract_strided_slice %30 {offsets = [0, 113], sizes = [8, 256], strides = [1, 1]} : vector<8x512xbf16> to vector<8x256xbf16>
    %cst_13 = arith.constant 0.000000e+00 : bf16
    %38 = vector.shape_cast %20 : vector<1x256xi1> to vector<1x256xi1>
    %39 = vector.broadcast %38 : vector<1x256xi1> to vector<8x256xi1>
    %40 = vector.broadcast %cst_13 : bf16 to vector<8x256xbf16>
    %41 = arith.select %39, %40, %37 : vector<8x256xi1>, vector<8x256xbf16>
    %42 = vector.extract_strided_slice %30 {offsets = [0, 127], sizes = [8, 256], strides = [1, 1]} : vector<8x512xbf16> to vector<8x256xbf16>
    %cst_14 = arith.constant 0.000000e+00 : bf16
    %43 = vector.shape_cast %18 : vector<1x256xi1> to vector<1x256xi1>
    %44 = vector.broadcast %43 : vector<1x256xi1> to vector<8x256xi1>
    %45 = vector.broadcast %cst_14 : bf16 to vector<8x256xbf16>
    %46 = arith.select %44, %45, %42 : vector<8x256xi1>, vector<8x256xbf16>
    %47 = vector.extract_strided_slice %30 {offsets = [0, 128], sizes = [8, 256], strides = [1, 1]} : vector<8x512xbf16> to vector<8x256xbf16>
    %48 = vector.extract_strided_slice %30 {offsets = [0, 129], sizes = [8, 256], strides = [1, 1]} : vector<8x512xbf16> to vector<8x256xbf16>
    %cst_15 = arith.constant 0.000000e+00 : bf16
    %49 = vector.shape_cast %20 : vector<1x256xi1> to vector<1x256xi1>
    %50 = vector.broadcast %49 : vector<1x256xi1> to vector<8x256xi1>
    %51 = vector.broadcast %cst_15 : bf16 to vector<8x256xbf16>
    %52 = arith.select %50, %51, %48 : vector<8x256xi1>, vector<8x256xbf16>
    %53 = vector.extract_strided_slice %30 {offsets = [0, 143], sizes = [8, 256], strides = [1, 1]} : vector<8x512xbf16> to vector<8x256xbf16>
    %cst_16 = arith.constant 0.000000e+00 : bf16
    %54 = vector.shape_cast %18 : vector<1x256xi1> to vector<1x256xi1>
    %55 = vector.broadcast %54 : vector<1x256xi1> to vector<8x256xi1>
    %56 = vector.broadcast %cst_16 : bf16 to vector<8x256xbf16>
    %57 = arith.select %55, %56, %53 : vector<8x256xi1>, vector<8x256xbf16>
    %58 = vector.extract_strided_slice %30 {offsets = [0, 144], sizes = [8, 256], strides = [1, 1]} : vector<8x512xbf16> to vector<8x256xbf16>
    %59 = vector.extract_strided_slice %30 {offsets = [0, 145], sizes = [8, 256], strides = [1, 1]} : vector<8x512xbf16> to vector<8x256xbf16>
    %cst_17 = arith.constant 0.000000e+00 : bf16
    %60 = vector.shape_cast %20 : vector<1x256xi1> to vector<1x256xi1>
    %61 = vector.broadcast %60 : vector<1x256xi1> to vector<8x256xi1>
    %62 = vector.broadcast %cst_17 : bf16 to vector<8x256xbf16>
    %63 = arith.select %61, %62, %59 : vector<8x256xi1>, vector<8x256xbf16>
    %64 = tpu.concatenate %35, %36, %41, %46, %47, %52, %57, %58, %63 in 0 : vector<8x256xbf16>, vector<8x256xbf16>, vector<8x256xbf16>, vector<8x256xbf16>, vector<8x256xbf16>, vector<8x256xbf16>, vector<8x256xbf16>, vector<8x256xbf16>, vector<8x256xbf16> -> vector<72x256xbf16>
    %c0_18 = arith.constant 0 : index
    %c0_19 = arith.constant 0 : index
    %65 = vector.load %arg4[%c0_18, %c0_19] : memref<8x72xbf16, #tpu.memory_space<vmem>>, vector<8x72xbf16>
    %cst_20 = arith.constant dense<0.000000e+00> : vector<8x256xf32>
    %66 = tpu.matmul %65, %64, %cst_20 {dimension_numbers = #tpu.dot_dimension_numbers<[1], [0], [0], [1], [0, 0, 1, 1], [], []>} : vector<8x72xbf16>, vector<72x256xbf16>, vector<8x256xf32> -> vector<8x256xf32>
    %c0_21 = arith.constant 0 : index
    %c0_22 = arith.constant 0 : index
    %67 = vector.load %arg5[%c0_21, %c0_22] : memref<8x1xf32, #tpu.memory_space<vmem>>, vector<8x1xf32>
    %68 = vector.broadcast %67 : vector<8x1xf32> to vector<8x256xf32>
    %69 = arith.addf %66, %68 : vector<8x256xf32>
    %cst_23 = arith.constant 0.000000e+00 : f32
    %70 = vector.broadcast %cst_23 : f32 to vector<8x256xf32>
    %71 = arith.maximumf %69, %70 : vector<8x256xf32>
    %72 = arith.truncf %71 : vector<8x256xf32> to vector<8x256xbf16>
    %cst_24 = arith.constant 0.000000e+00 : bf16
    %73 = vector.broadcast %cst_24 : bf16 to vector<8x128xbf16>
    %74 = tpu.concatenate %73, %72, %73 in 1 : vector<8x128xbf16>, vector<8x256xbf16>, vector<8x128xbf16> -> vector<8x512xbf16>
    %75 = vector.extract_strided_slice %74 {offsets = [0, 111], sizes = [8, 256], strides = [1, 1]} : vector<8x512xbf16> to vector<8x256xbf16>
    %cst_25 = arith.constant 0.000000e+00 : bf16
    %76 = vector.shape_cast %18 : vector<1x256xi1> to vector<1x256xi1>
    %77 = vector.broadcast %76 : vector<1x256xi1> to vector<8x256xi1>
    %78 = vector.broadcast %cst_25 : bf16 to vector<8x256xbf16>
    %79 = arith.select %77, %78, %75 : vector<8x256xi1>, vector<8x256xbf16>
    %80 = vector.extract_strided_slice %74 {offsets = [0, 112], sizes = [8, 256], strides = [1, 1]} : vector<8x512xbf16> to vector<8x256xbf16>
    %81 = vector.extract_strided_slice %74 {offsets = [0, 113], sizes = [8, 256], strides = [1, 1]} : vector<8x512xbf16> to vector<8x256xbf16>
    %cst_26 = arith.constant 0.000000e+00 : bf16
    %82 = vector.shape_cast %20 : vector<1x256xi1> to vector<1x256xi1>
    %83 = vector.broadcast %82 : vector<1x256xi1> to vector<8x256xi1>
    %84 = vector.broadcast %cst_26 : bf16 to vector<8x256xbf16>
    %85 = arith.select %83, %84, %81 : vector<8x256xi1>, vector<8x256xbf16>
    %86 = vector.extract_strided_slice %74 {offsets = [0, 127], sizes = [8, 256], strides = [1, 1]} : vector<8x512xbf16> to vector<8x256xbf16>
    %cst_27 = arith.constant 0.000000e+00 : bf16
    %87 = vector.shape_cast %18 : vector<1x256xi1> to vector<1x256xi1>
    %88 = vector.broadcast %87 : vector<1x256xi1> to vector<8x256xi1>
    %89 = vector.broadcast %cst_27 : bf16 to vector<8x256xbf16>
    %90 = arith.select %88, %89, %86 : vector<8x256xi1>, vector<8x256xbf16>
    %91 = vector.extract_strided_slice %74 {offsets = [0, 128], sizes = [8, 256], strides = [1, 1]} : vector<8x512xbf16> to vector<8x256xbf16>
    %92 = vector.extract_strided_slice %74 {offsets = [0, 129], sizes = [8, 256], strides = [1, 1]} : vector<8x512xbf16> to vector<8x256xbf16>
    %cst_28 = arith.constant 0.000000e+00 : bf16
    %93 = vector.shape_cast %20 : vector<1x256xi1> to vector<1x256xi1>
    %94 = vector.broadcast %93 : vector<1x256xi1> to vector<8x256xi1>
    %95 = vector.broadcast %cst_28 : bf16 to vector<8x256xbf16>
    %96 = arith.select %94, %95, %92 : vector<8x256xi1>, vector<8x256xbf16>
    %97 = vector.extract_strided_slice %74 {offsets = [0, 143], sizes = [8, 256], strides = [1, 1]} : vector<8x512xbf16> to vector<8x256xbf16>
    %cst_29 = arith.constant 0.000000e+00 : bf16
    %98 = vector.shape_cast %18 : vector<1x256xi1> to vector<1x256xi1>
    %99 = vector.broadcast %98 : vector<1x256xi1> to vector<8x256xi1>
    %100 = vector.broadcast %cst_29 : bf16 to vector<8x256xbf16>
    %101 = arith.select %99, %100, %97 : vector<8x256xi1>, vector<8x256xbf16>
    %102 = vector.extract_strided_slice %74 {offsets = [0, 144], sizes = [8, 256], strides = [1, 1]} : vector<8x512xbf16> to vector<8x256xbf16>
    %103 = vector.extract_strided_slice %74 {offsets = [0, 145], sizes = [8, 256], strides = [1, 1]} : vector<8x512xbf16> to vector<8x256xbf16>
    %cst_30 = arith.constant 0.000000e+00 : bf16
    %104 = vector.shape_cast %20 : vector<1x256xi1> to vector<1x256xi1>
    %105 = vector.broadcast %104 : vector<1x256xi1> to vector<8x256xi1>
    %106 = vector.broadcast %cst_30 : bf16 to vector<8x256xbf16>
    %107 = arith.select %105, %106, %103 : vector<8x256xi1>, vector<8x256xbf16>
    %108 = tpu.concatenate %79, %80, %85, %90, %91, %96, %101, %102, %107 in 0 : vector<8x256xbf16>, vector<8x256xbf16>, vector<8x256xbf16>, vector<8x256xbf16>, vector<8x256xbf16>, vector<8x256xbf16>, vector<8x256xbf16>, vector<8x256xbf16>, vector<8x256xbf16> -> vector<72x256xbf16>
    %c0_31 = arith.constant 0 : index
    %c0_32 = arith.constant 0 : index
    %109 = vector.load %arg6[%c0_31, %c0_32] : memref<4x72xbf16, #tpu.memory_space<vmem>>, vector<4x72xbf16>
    %cst_33 = arith.constant dense<0.000000e+00> : vector<4x256xf32>
    %110 = tpu.matmul %109, %108, %cst_33 {dimension_numbers = #tpu.dot_dimension_numbers<[1], [0], [0], [1], [0, 0, 1, 1], [], []>} : vector<4x72xbf16>, vector<72x256xbf16>, vector<4x256xf32> -> vector<4x256xf32>
    %c0_34 = arith.constant 0 : index
    %c0_35 = arith.constant 0 : index
    %111 = vector.load %arg7[%c0_34, %c0_35] : memref<4x1xf32, #tpu.memory_space<vmem>>, vector<4x1xf32>
    %112 = vector.broadcast %111 : vector<4x1xf32> to vector<4x256xf32>
    %113 = arith.addf %110, %112 : vector<4x256xf32>
    %cst_36 = arith.constant 0.000000e+00 : f32
    %114 = vector.broadcast %cst_36 : f32 to vector<4x256xf32>
    %115 = arith.maximumf %113, %114 : vector<4x256xf32>
    %c0_37 = arith.constant 0 : index
    %c0_38 = arith.constant 0 : index
    %c0_39 = arith.constant 0 : index
    %116 = vector.load %arg8[%c0_37, %c0_38, %c0_39] : memref<1x4x256xf32, #tpu.memory_space<vmem>>, vector<1x4x256xf32>
    %117 = vector.shape_cast %116 : vector<1x4x256xf32> to vector<4x256xf32>
    %118 = vector.shape_cast %115 : vector<4x256xf32> to vector<1x4x256xf32>
    tpu.vector_store %arg8[%c0_37, %c0_38, %c0_39], %118 {strides = array<i32>} : memref<1x4x256xf32, #tpu.memory_space<vmem>>, vector<1x4x256xf32>,
    return
  }
  func.func @transform_0(%arg0: i32) -> (i32, i32, i32) {
    %c0_i32 = arith.constant 0 : i32
    %c0_i32_0 = arith.constant 0 : i32
    %c0_i32_1 = arith.constant 0 : i32
    return %arg0, %c0_i32, %c0_i32_0 : i32, i32, i32
  }
  func.func @transform_1(%arg0: i32) -> (i32, i32, i32) {
    %c0_i32 = arith.constant 0 : i32
    %c0_i32_0 = arith.constant 0 : i32
    %c0_i32_1 = arith.constant 0 : i32
    return %arg0, %c0_i32, %c0_i32_0 : i32, i32, i32
  }
  func.func @transform_2(%arg0: i32) -> (i32, i32) {
    %c0_i32 = arith.constant 0 : i32
    %c0_i32_0 = arith.constant 0 : i32
    %c0_i32_1 = arith.constant 0 : i32
    return %c0_i32, %c0_i32_0 : i32, i32
  }
  func.func @transform_3(%arg0: i32) -> (i32, i32) {
    %c0_i32 = arith.constant 0 : i32
    %c0_i32_0 = arith.constant 0 : i32
    %c0_i32_1 = arith.constant 0 : i32
    return %c0_i32, %c0_i32_0 : i32, i32
  }
  func.func @transform_4(%arg0: i32) -> (i32, i32) {
    %c0_i32 = arith.constant 0 : i32
    %c0_i32_0 = arith.constant 0 : i32
    %c0_i32_1 = arith.constant 0 : i32
    return %c0_i32, %c0_i32_0 : i32, i32
  }
  func.func @transform_5(%arg0: i32) -> (i32, i32) {
    %c0_i32 = arith.constant 0 : i32
    %c0_i32_0 = arith.constant 0 : i32
    %c0_i32_1 = arith.constant 0 : i32
    return %c0_i32, %c0_i32_0 : i32, i32
  }
  func.func @transform_6(%arg0: i32) -> (i32, i32) {
    %c0_i32 = arith.constant 0 : i32
    %c0_i32_0 = arith.constant 0 : i32
    %c0_i32_1 = arith.constant 0 : i32
    return %c0_i32, %c0_i32_0 : i32, i32
  }
  func.func @transform_7(%arg0: i32) -> (i32, i32, i32) {
    %c0_i32 = arith.constant 0 : i32
    %c0_i32_0 = arith.constant 0 : i32
    %c0_i32_1 = arith.constant 0 : i32
    return %arg0, %c0_i32, %c0_i32_0 : i32, i32, i32
  }
}

</mosaic_0001>

<bundles_post_ra>
// kernel: up_forward.1
= control target key start
LH: loop header
LB: loop body
LE: loop exit
PB: predicated region body
PF: predicated region fallthrough
CT: control target
= control target key end

     0   :  { %s1210_s24 = smov 0   ;;  %s1584_s0 = inlined_call_operand.vmem [shape: bf16[2,4,64], index: 0, kind: input, shape index: {}]   ;;  %s1585_s1 = inlined_call_operand.vmem [shape: bf16[2,4,256], index: 1, kind: input, shape index: {}]   ;;  %s1586_s2 = inlined_call_operand.vmem [shape: bf16[64,256], index: 2, kind: input, shape index: {}]   ;;  %s1587_s3 = inlined_call_operand.vmem [shape: bf16[8,72], index: 3, kind: input, shape index: {}]   ;;  %s1588_s4 = inlined_call_operand.vmem [shape: f32[8,1], index: 4, kind: input, shape index: {}]   ;;  %s1589_s5 = inlined_call_operand.vmem [shape: bf16[4,72], index: 5, kind: input, shape index: {}]   ;;  %s1590_s6 = inlined_call_operand.vmem [shape: f32[4,1], index: 6, kind: input, shape index: {}]   ;;  %s1591_s7 = inlined_call_operand.vmem [shape: f32[2,4,256], index: 7, kind: output, shape index: {}]  }
   0x1 LB: > { %s1086_s25 = sadd.s32 4294967295, %s1155_s24   ;;  %p1090_p0 = scmp.ge.s32.totalorder %s1155_s24, 1  ;;  %s1155_s24 = sphi %s1210_s24, %s17_s24  }
   0x2   : > { %p246_p1 = scmp.lt.s32.totalorder %s1155_s24, 3 }
   0x4   : > { %p247_p2 = pnand %p1090_p0, %p246_p1 }
   0x5   : > { %v1137_v0 = vld [vmem:[%s1586_s2 + $0x4] ss:$8 sps:$4 sm:$0xff] (!%p247_p2)   ;;  %v299_v1 = vlaneseq (!%p247_p2)  ;;  %v1139_v2 = vld [vmem:[%s1586_s2] ss:$8 sps:$4 sm:$0xff] (!%p247_p2)   ;;  %v1157_v3 = vmov (!%p247_p2), 0   ;;  %p282_p3 = scmp.lt.s32.totalorder (!%p247_p2), %s1086_s25, 1 }
   0x6   : > { %250 = sbr.rel (%p247_p2) target bundleno = 1244 (0x4dc), region = 48  ;;  %415 = vmatprep.mubr.bf16.mxu0 (!%p247_p2), %v1157_v3  ;;  %770 = vmatprep.mubr.bf16.mxu1 (!%p247_p2), %v1157_v3  ;;  %v1140_v4 = vld [vmem:[%s1586_s2 + $0x14] ss:$8 sps:$4 sm:$0xff] (!%p247_p2)   ;;  %v1142_v5 = vld [vmem:[%s1586_s2 + $0x10] ss:$8 sps:$4 sm:$0xff] (!%p247_p2)   ;;  %s1158_s23 = smov (!%p247_p2), 113  }
   0x7   : > { %383 = vmatprep.subr.bf16.mxu0 (!%p247_p2), %v1137_v0  ;;  %1135 = vset.pattern.permute.xlu0 (!%p247_p2), %v1157_v3  ;;  %v300_v6 = vand.u32 (!%p247_p2), 127, %v299_v1  ;;  %v1143_v7 = vld [vmem:[%s1586_s2 + $0x24] ss:$8 sps:$4 sm:$0xff] (!%p247_p2)   ;;  %v456_v8 = vshrl.u32 (!%p247_p2), %v299_v1, 7  ;;  %v1145_v11 = vld [vmem:[%s1586_s2 + $0x20] ss:$8 sps:$4 sm:$0xff] (!%p247_p2)  }
   0x8   : > { %384 = vmatpush1.bf16.msra.mxu0 (!%p247_p2), %v1139_v2  ;;  %1136 = vset.pattern.permute.xlu1 (!%p247_p2), %v1157_v3  ;;  %v1146_v13 = vld [vmem:[%s1586_s2 + $0x34] ss:$8 sps:$4 sm:$0xff] (!%p247_p2)   ;;  %v1148_v16 = vld [vmem:[%s1586_s2 + $0x30] ss:$8 sps:$4 sm:$0xff] (!%p247_p2)   ;;  %vm379_vm6 = vcmask (!%p247_p2), 523264   ;;  %s1159_s26 = smov (!%p247_p2), 127  }
   0x9   : > { %385 = vmatprep.subr.bf16.mxu0 (!%p247_p2), %v1140_v4  ;;  %v301_v9 = vadd.s32 (!%p247_p2), 128, %v300_v6  ;;  %v306_v10 = vand.u32 (!%p247_p2), 15, %v300_v6  ;;  %v457_v14 = vsub.s32 (!%p247_p2), 0, %v456_v8  ;;  %v461_v15 = vsub.s32 (!%p247_p2), 4, %v456_v8  ;;  %s1160_s27 = smov (!%p247_p2), 1   ;;  %s1161_s28 = smov (!%p247_p2), 15  }
   0xa   : > { %s1162_s29 = smov (!%p247_p2), 17   ;;  %s1163_s30 = smov (!%p247_p2), 111   ;;  %v1262_v24 = vrot.slane (!%p247_p2), %v1157_v3, 4  ;;  %vm491_vm7 = vcmask (!%p247_p2), 924672   ;;  %vm440_vm8 = vcmask (!%p247_p2), 1041408   ;;  %vm521_vm9 = vcmask (!%p247_p2), 121856  }
   0xb   : > { %v313_v12 = vand.u32 (!%p247_p2), 15, %v301_v9  ;;  %vm328_vm0 = vcmp.eq.s32.totalorder (!%p247_p2), %v306_v10, 15  ;;  %vm326_vm1 = vcmp.eq.s32.totalorder (!%p247_p2), %v306_v10, 0  ;;  %s1164_s8 = smov (!%p247_p2), 126   ;;  %s1165_s9 = smov (!%p247_p2), 112   ;;  %vm511_vm13 = vcmask (!%p247_p2), 7168  }
   0xc   : > { %386 = vmatpush1.bf16.msra.mxu0 (!%p247_p2), %v1142_v5  ;;  %s1166_s10 = smov (!%p247_p2), 110   ;;  %s1167_s11 = smov (!%p247_p2), 96   ;;  %vm501_vm14 = vcmask (!%p247_p2), 1039360  }
   0xd   : > { %s1609_s25 = smov (!%p282_p3, %s1086_s25), 1  ;;  %387 = vmatprep.subr.bf16.mxu0 %v1143_v7  ;;  %vm329_vm2 = vcmp.eq.s32.totalorder %v313_v12, 15  ;;  %vm327_vm3 = vcmp.eq.s32.totalorder %v313_v12, 0  ;;  %s1168_s16 = smov 95  }
   0xe   : > { %s1091_s17 = sshll.u32 %s1609_s25, 1  ;;  %vm477_vm4 = vmpackc.low %vm329_vm2, %vm328_vm0  ;;  %s1112_s12 = sshll.u32 %s1609_s25, 2 }
   0xf   : > { %v478_v17 = vsel %vm477_vm4, 65537, %v1157_v3  ;;  %vm453_vm5 = vmpackc.low %vm327_vm3, %vm326_vm1  ;;  %s285_s22 = scalar_lea.vmem %s1584_s0, %s1091_s17  ;;  %s290_s15 = scalar_lea.vmem %s1585_s1, %s1112_s12  ;;  %vm531_vm4 = vcmask 138240  }
  0x10   : > { %388 = vmatpush1.bf16.msra.mxu0 %v1145_v11  ;;  %v482_v18 = vrot.slane %v478_v17, %v457_v14  ;;  %v454_v19 = vsel %vm453_vm5, 65537, %v1157_v3  ;;  %v486_v21 = vrot.slane %v478_v17, %v461_v15  ;;  %v330_v22 = vld [vmem:[%s285_s22] sm:$0x3]  ;;  %s1169_s17 = smov 94  }
  0x11   : > { %389 = vmatprep.subr.bf16.mxu0 %v1146_v13  ;;  %v458_v20 = vrot.slane %v454_v19, %v457_v14  ;;  %v462_v23 = vrot.slane %v454_v19, %v461_v15  ;;  %v1105_v30 = vld.sshfl [vmem:[%s290_s15] sm:$0x33 pattern:$0x76325410] }
  0x12   : > { %487 = vrot.lane.b32.xlu1 %v482_v18, %s1158_s23  ;;  %v435_v35 = vcombine.high %v1105_v30, %v1105_v30 }
  0x13   : > { %497 = vrot.lane.b32.xlu0 %v458_v20, %s1159_s26 }
  0x14   : > { %390 = vmatpush1.bf16.msra.mxu0 %v1148_v16 }
  0x16   : > { %489 = vrot.lane.b32.xlu1 %v486_v21, %s1158_s23 }
  0x17   : > { %1104 = vmatmul.mubr.msk.bf16.vlgmr.msra.gmra.mrb[0].mxu0 %vm379_vm6, %v330_v22  ;;  %499 = vrot.lane.b32.xlu0 %v462_v23, %s1159_s26 }
  0x18   : > { %1003 = vmatprep.mubr.bf16.mxu0 %v1157_v3 }
  0x1a   : > { %509 = vrot.lane.b32.xlu1 %v486_v21, %s1160_s27 }
  0x1b   : > { %507 = vrot.lane.b32.xlu0 %v482_v18, %s1160_s27 }
  0x1e   : > { %519 = vrot.lane.b32.xlu1 %v462_v23, %s1161_s28 }
  0x1f   : > { %517 = vrot.lane.b32.xlu0 %v458_v20, %s1161_s28  ;;  %s1113_s28 = sshll.u32 %s1609_s25, 3 }
  0x22   : > { %529 = vrot.lane.b32.xlu1 %v486_v21, %s1162_s29 }
  0x23   : > { %527 = vrot.lane.b32.xlu0 %v482_v18, %s1162_s29 }
  0x26   : > { %465 = vrot.lane.b32.xlu1 %v462_v23, %s1163_s30 }
  0x27   : > { %463 = vrot.lane.b32.xlu0 %v458_v20, %s1163_s30 }
  0x2a   : > { %553 = vrot.lane.b32.xlu1 %v1157_v3, %s1164_s8 }
  0x2b   : > { %543 = vrot.lane.b32.xlu0 %v1262_v24, %s1159_s26 }
  0x2e   : > { %588 = vrot.lane.b32.xlu1 %v1262_v24, %s1166_s10 }
  0x2f   : > { %566 = vrot.lane.b32.xlu0 %v1262_v24, %s1165_s9 }
  0x33   : > { %599 = vrot.lane.b32.xlu0 %v1157_v3, %s1167_s11 }
  0x84   : > { %v488_v25 = vpop.permute.xlu1 %487 }
  0x85   : > { %v498_v26 = vpop.permute.xlu0 %497 }
  0x88   : > { %v1274_v27 = vpop.permute.xlu1 %489 }
  0x89   : > { %v1277_v28 = vpop.permute.xlu0 %499  ;;  %v1285_v41 = vsel %vm491_vm7, %v488_v25, %v1274_v27  ;;  %vm494_vm15 = vcmp.ne.s16.totalorder %v1274_v27, 0  ;;  %vm624_vm7 = vcmask 1043456  }
  0x8a   : > { %vm493_vm11 = vcmp.ne.s16.totalorder %v1285_v41, 0  ;;  %v1323_v52 = vsel %vm501_vm14, %v498_v26, %v1277_v28  ;;  %vm1596_vm0 = vcmp.ne.s16.totalorder %v1277_v28, 0 }
  0x8b   : > { %vm503_vm2 = vcmp.ne.s16.totalorder %v1323_v52, 0 }
  0x8c   : > { %v510_v29 = vpop.permute.xlu1 %509 }
  0x8d   : > { %v1282_v31 = vpop.permute.xlu0 %507 }
  0x8e   : > { %v1318_v51 = vsel %vm511_vm13, %v1282_v31, %v510_v29  ;;  %vm513_vm3 = vcmp.ne.s16.totalorder %v1282_v31, 0  ;;  %vm572_vm13 = vcmask 916480  }
  0x8f   : > { %vm1595_vm1 = vcmp.ne.s16.totalorder %v1318_v51, 0 }
  0x90   : > { %v520_v43 = vpop.permute.xlu1 %519 }
  0x91   : > { %v1289_v44 = vpop.permute.xlu0 %517 }
  0x92   : > { %v1296_v46 = vsel %vm521_vm9, %v1289_v44, %v520_v43  ;;  %vm523_vm10 = vcmp.ne.s16.totalorder %v1289_v44, 0  ;;  %vm559_vm9 = vcmask 1031168  }
  0x93   : > { %vm524_vm12 = vcmp.ne.s16.totalorder %v1296_v46, 0 }
  0x94   : > { %v530_v63 = vpop.permute.xlu1 %529 }
  0x95   : > { %v1351_v0 = vpop.permute.xlu0 %527 }
  0x96   : > { %v1356_v1 = vsel %vm531_vm4, %v1351_v0, %v530_v63  ;;  %vm1594_vm5 = vcmp.ne.s16.totalorder %v1351_v0, 0 }
  0x97   : > { %vm1592_vm6 = vcmp.ne.s16.totalorder %v1356_v1, 0 }
  0x98   : > { %v1375_v7 = vpop.permute.xlu1 %465 }
  0x99   : > { %v464_v5 = vpop.permute.xlu0 %463 }
  0x9c   : > { %v1377_v8 = vpop.permute.xlu1 %553 }
  0x9d   : > { %v1373_v6 = vpop.permute.xlu0 %543 }
  0xa0   : > { %v1381_v10 = vpop.permute.xlu1 %588 }
  0xa1   : > { %v1379_v9 = vpop.permute.xlu0 %566 }
  0xa5   : > { %v1383_v11 = vpop.permute.xlu0 %599 }
  0xea   : > { %v417_v32 = vpop.f32.mrb[0].mxu0 }
  0xeb   : > { %v425_v33 = vpack.c.bf16 %v417_v32, %v417_v32  ;;  %v419_v34 = vpop.f32.mrb[1].mxu0 }
  0xec   : > { %v426_v36 = vpack.c.bf16 %v419_v34, %v419_v34  ;;  %v421_v37 = vpop.f32.mrb[2].mxu0 }
  0xed   : > { %v438_v38 = vrot.slane %v425_v33, 6  ;;  %v422_v39 = vpop.f32.mrb[3].mxu0 }
  0xee   : > { %v439_v40 = vrot.slane %v426_v36, 6 }
  0xef   : > { %v1287_v42 = vsel %vm440_vm8, %v1105_v30, %v438_v38 }
  0xf0   : > { %v1291_v45 = vsel %vm440_vm8, %v435_v35, %v439_v40  ;;  %575 = vrot.lane.b32.xlu1 %v1287_v42, %s1163_s30  ;;  %v495_v47 = vsel %vm493_vm11, 0, %v1287_v42  ;;  %v525_v48 = vsel %vm523_vm10, 0, %v1287_v42  ;;  %v541_v50 = vrot.slane %v1287_v42, 4 }
  0xf1   : > { %577 = vrot.lane.b32.xlu0 %v1291_v45, %s1163_s30  ;;  %v526_v49 = vsel %vm524_vm12, 0, %v1291_v45  ;;  %v496_v53 = vsel %vm494_vm15, 0, %v1291_v45  ;;  %v506_v54 = vsel %vm1596_vm0, 0, %v1291_v45  ;;  %v542_v55 = vrot.slane %v1291_v45, 4 }
  0xf2   : > { %v565_v56 = vrot.slane %v506_v54, 4  ;;  %v505_v57 = vsel %vm503_vm2, 0, %v1287_v42  ;;  %v516_v58 = vsel %vm1595_vm1, 0, %v1291_v45  ;;  %v515_v61 = vsel %vm513_vm3, 0, %v1287_v42 }
  0xf3   : > { %v564_v59 = vrot.slane %v505_v57, 4  ;;  %v583_v60 = vrot.slane %v516_v58, 4  ;;  %v582_v62 = vrot.slane %v515_v61, 4  ;;  %v535_v2 = vsel %vm1594_vm5, 0, %v1287_v42 }
  0xf4   : > { %555 = vrot.lane.b32.xlu1 %v495_v47, %s1164_s8  ;;  %v536_v4 = vsel %vm1592_vm6, 0, %v1291_v45  ;;  %vm1593_vm8 = vcmp.ne.s16.totalorder %v1375_v7, 0  ;;  %vm467_vm6 = vcmask 908288   ;;  %vm1597_vm5 = vcmask 777216  }
  0xf5   : > { %595 = vrot.lane.b32.xlu0 %v525_v48, %s1167_s11  ;;  %v472_v21 = vsel %vm1593_vm8, 0, %v1291_v45  ;;  %v1401_v32 = vsel %vm467_vm6, %v464_v5, %v1375_v7  ;;  %vm601_vm8 = vcmask 785408   ;;  %vm590_vm0 = vcmask 900096  }
  0xf6   : > { %vm469_vm1 = vcmp.ne.s16.totalorder %v1401_v32, 0 }
  0xf7   : > { %v471_v43 = vsel %vm469_vm1, 0, %v1287_v42 }
  0xf8   : > { %597 = vrot.lane.b32.xlu1 %v526_v49, %s1167_s11 }
  0xf9   : > { %545 = vrot.lane.b32.xlu0 %v541_v50, %s1159_s26 }
  0xfc   : > { %604 = vrot.lane.b32.xlu1 %v541_v50, %s1168_s16 }
  0xfd   : > { %557 = vrot.lane.b32.xlu0 %v496_v53, %s1164_s8 }
 0x100   : > { %547 = vrot.lane.b32.xlu1 %v542_v55, %s1159_s26 }
 0x101   : > { %570 = vrot.lane.b32.xlu0 %v565_v56, %s1165_s9 }
 0x104   : > { %568 = vrot.lane.b32.xlu1 %v564_v59, %s1165_s9 }
 0x105   : > { %586 = vrot.lane.b32.xlu0 %v583_v60, %s1166_s10 }
 0x108   : > { %584 = vrot.lane.b32.xlu1 %v582_v62, %s1166_s10 }
 0x109   : > { %606 = vrot.lane.b32.xlu0 %v542_v55, %s1168_s16 }
 0x10c   : > { %608 = vrot.lane.b32.xlu1 %v1262_v24, %s1168_s16 }
 0x10d   : > { %615 = vrot.lane.b32.xlu0 %v535_v2, %s1169_s17 }
 0x110   : > { %617 = vrot.lane.b32.xlu1 %v536_v4, %s1169_s17  ;;  %v662_v4 = vld [vmem:[%s1588_s4] sm:$0xff] }
 0x111   : > { %619 = vrot.lane.b32.xlu0 %v1157_v3, %s1169_s17 }
 0x162   : > { %v576_v12 = vpop.permute.xlu1 %575 }
 0x163   : > { %v578_v13 = vpop.permute.xlu0 %577 }
 0x164   : > { %v579_v60 = vsel %vm467_vm6, %v576_v12, %v578_v13 }
 0x166   : > { %v556_v14 = vpop.permute.xlu1 %555 }
 0x167   : > { %v596_v15 = vpop.permute.xlu0 %595  ;;  %v560_v26 = vsel %vm559_vm9, %v1377_v8, %v556_v14 }
 0x16a   : > { %v598_v16 = vpop.permute.xlu1 %597 }
 0x16b   : > { %v546_v3 = vpop.permute.xlu0 %545  ;;  %v602_v37 = vsel %vm601_vm8, %v596_v15, %v598_v16  ;;  %v603_v56 = vsel %vm601_vm8, %v598_v16, %v1383_v11 }
 0x16c   : > { %v549_v17 = vsel %vm501_vm14, %v1373_v6, %v546_v3 }
 0x16d   : > { %v627_v18 = vsel %vm624_vm7, 0, %v549_v17 }
 0x16e   : > { %680 = vrot.lane.b32.xlu1 %v627_v18, %s1162_s29  ;;  %v605_v19 = vpop.permute.xlu1 %604 }
 0x16f   : > { %v558_v20 = vpop.permute.xlu0 %557  ;;  %v654_v59 = vsel %vm624_vm7, %v596_v15, %v605_v19 }
 0x170   : > { %v561_v48 = vsel %vm559_vm9, %v556_v14, %v558_v20 }
 0x172   : > { %v548_v22 = vpop.permute.xlu1 %547 }
 0x173   : > { %v571_v23 = vpop.permute.xlu0 %570  ;;  %v633_v24 = vsel %vm624_vm7, %v472_v21, %v548_v22  ;;  %v550_v38 = vsel %vm501_vm14, %v546_v3, %v548_v22 }
 0x174   : > { %684 = vrot.lane.b32.xlu0 %v633_v24, %s1162_s29  ;;  %v630_v47 = vsel %vm624_vm7, %v471_v43, %v550_v38  ;;  %v642_v42 = vsel %vm624_vm7, %v558_v20, %v571_v23 }
 0x176   : > { %v569_v25 = vpop.permute.xlu1 %568 }
 0x177   : > { %v573_v29 = vsel %vm572_vm13, %v1379_v9, %v569_v25  ;;  %v587_v30 = vpop.permute.xlu0 %586  ;;  %v574_v45 = vsel %vm572_vm13, %v569_v25, %v571_v23 }
 0x178   : > { %v636_v33 = vsel %vm624_vm7, %v560_v26, %v573_v29  ;;  %v639_v50 = vsel %vm624_vm7, %v561_v48, %v574_v45  ;;  %v592_v53 = vsel %vm590_vm0, %v587_v30, %v1381_v10  ;;  %v661_v45 = vld [vmem:[%s1587_s3] sm:$0xf] }
 0x179   : > { %686 = vrot.lane.b32.xlu0 %v636_v33, %s1162_s29  ;;  %v651_v55 = vsel %vm624_vm7, %v578_v13, %v592_v53 }
 0x17a   : > { %v585_v34 = vpop.permute.xlu1 %584 }
 0x17b   : > { %v607_v35 = vpop.permute.xlu0 %606  ;;  %v645_v36 = vsel %vm624_vm7, %v576_v12, %v585_v34  ;;  %v591_v58 = vsel %vm590_vm0, %v585_v34, %v587_v30 }
 0x17c   : > { %v611_v39 = vsel %vm1597_vm5, %v605_v19, %v607_v35  ;;  %692 = vrot.lane.b32.xlu1 %v645_v36, %s1162_s29  ;;  %v648_v63 = vsel %vm624_vm7, %v579_v60, %v591_v58 }
 0x17d   : > { %v657_v40 = vsel %vm624_vm7, %v602_v37, %v611_v39 }
 0x17e   : > { %700 = vrot.lane.b32.xlu0 %v657_v40, %s1162_s29  ;;  %v1420_v49 = vpop.permute.xlu1 %608 }
 0x17f   : > { %v612_v54 = vsel %vm1597_vm5, %v607_v35, %v1420_v49  ;;  %v616_v61 = vpop.permute.xlu0 %615  ;;  %vm1598_vm5 = vcmask 769024  }
 0x180   : > { %682 = vrot.lane.b32.xlu1 %v630_v47, %s1162_s29  ;;  %v660_v57 = vsel %vm624_vm7, %v603_v56, %v612_v54 }
 0x182   : > { %688 = vrot.lane.b32.xlu0 %v639_v50, %s1162_s29  ;;  %v618_v62 = vpop.permute.xlu1 %617 }
 0x183   : > { %v622_v2 = vsel %vm1598_vm5, %v616_v61, %v618_v62  ;;  %v1447_v5 = vpop.permute.xlu0 %619 }
 0x184   : > { %690 = vrot.lane.b32.xlu1 %v642_v42, %s1162_s29  ;;  %v623_v12 = vsel %vm1598_vm5, %v618_v62, %v1447_v5  ;;  %vm728_vm5 = vcmask 588800  }
 0x186   : > { %696 = vrot.lane.b32.xlu0 %v651_v55, %s1162_s29 }
 0x188   : > { %702 = vrot.lane.b32.xlu1 %v660_v57, %s1162_s29 }
 0x18a   : > { %698 = vrot.lane.b32.xlu0 %v654_v59, %s1162_s29 }
 0x18c   : > { %694 = vrot.lane.b32.xlu1 %v648_v63, %s1162_s29 }
 0x18e   : > { %706 = vrot.lane.b32.xlu0 %v622_v2, %s1162_s29 }
 0x190   : > { %704 = vrot.lane.b32.xlu1 %v616_v61, %s1162_s29 }
 0x192   : > { %665 = vperm.xlu0 %1135, %v662_v4  }
 0x194   : > { %708 = vrot.lane.b32.xlu1 %v623_v12, %s1162_s29 }
 0x1e0   : > { %v681_v14 = vpop.permute.xlu1 %680 }
 0x1e6   : > { %v685_v13 = vpop.permute.xlu0 %684 }
 0x1eb   : > { %v687_v15 = vpop.permute.xlu0 %686 }
 0x1ee   : > { %v693_v16 = vpop.permute.xlu1 %692 }
 0x1f0   : > { %v701_v3 = vpop.permute.xlu0 %700 }
 0x1f2   : > { %v683_v17 = vpop.permute.xlu1 %682 }
 0x1f3   : > { %v711_v18 = vsel %vm531_vm4, %v683_v17, %v685_v13  ;;  %v710_v19 = vsel %vm531_vm4, %v681_v14, %v683_v17 }
 0x1f4   : > { %738 = vmatprep.subr.bf16.mxu1 %v711_v18  ;;  %v689_v20 = vpop.permute.xlu0 %688 }
 0x1f5   : > { %739 = vmatpush1.bf16.msra.mxu1 %v710_v19  ;;  %v712_v24 = vsel %vm531_vm4, %v687_v15, %v689_v20 }
 0x1f6   : > { %v691_v21 = vpop.permute.xlu1 %690 }
 0x1f7   : > { %v713_v22 = vsel %vm531_vm4, %v689_v20, %v691_v21 }
 0x1f8   : > { %740 = vmatprep.subr.bf16.mxu1 %v713_v22  ;;  %v697_v23 = vpop.permute.xlu0 %696 }
 0x1f9   : > { %741 = vmatpush1.bf16.msra.mxu1 %v712_v24 }
 0x1fa   : > { %v703_v25 = vpop.permute.xlu1 %702 }
 0x1fb   : > { %v717_v34 = vsel %vm531_vm4, %v701_v3, %v703_v25 }
 0x1fc   : > { %v699_v26 = vpop.permute.xlu0 %698 }
 0x1fd   : > { %v716_v37 = vsel %vm531_vm4, %v699_v26, %v701_v3 }
 0x1fe   : > { %v695_v29 = vpop.permute.xlu1 %694 }
 0x1ff   : > { %v715_v30 = vsel %vm531_vm4, %v695_v29, %v697_v23  ;;  %v714_v33 = vsel %vm531_vm4, %v693_v16, %v695_v29 }
 0x200   : > { %742 = vmatprep.subr.bf16.mxu1 %v715_v30  ;;  %v707_v36 = vpop.permute.xlu0 %706 }
 0x201   : > { %743 = vmatpush1.bf16.msra.mxu1 %v714_v33 }
 0x202   : > { %v705_v35 = vpop.permute.xlu1 %704  ;;  %744 = vmatprep.subr.bf16.mxu1 %v717_v34 }
 0x203   : > { %v718_v38 = vsel %vm531_vm4, %v705_v35, %v707_v36 }
 0x204   : > { %v733_v43 = vsel %vm624_vm7, %v718_v38, 0 }
 0x205   : > { %745 = vmatpush1.bf16.msra.mxu1 %v716_v37 }
 0x206   : > { %v709_v39 = vpop.permute.xlu1 %708 }
 0x207   : > { %v719_v40 = vsel %vm531_vm4, %v707_v36, %v709_v39 }
 0x208   : > { %1106 = vmatprep.subr.msk.bf16.mxu1 %vm624_vm7, %v719_v40 }
 0x209   : > { %747 = vmatpush1.bf16.msra.mxu1 %v733_v43 }
 0x20c   : > { %1107 = vmatmul.mubr.msk.bf16.vlgmr.msra.gmra.mrb[0].mxu1 %vm728_vm5, %v661_v45 }
 0x211   : > { %v666_v47 = vpop.permute.xlu0 %665 }
 0x2df   : > { %v772_v48 = vpop.f32.mrb[0].mxu1 }
 0x2e0   : > { %v773_v50 = vadd.f32 %v772_v48, %v666_v47  ;;  %v774_v53 = vpop.f32.mrb[1].mxu1 }
 0x2e1   : > { %v775_v42 = vadd.f32 %v774_v53, %v666_v47  ;;  %v776_v54 = vpop.f32.mrb[2].mxu1 }
 0x2e2   : > { %v779_v55 = vmax.f32 %v773_v50, 0.0  ;;  %v777_v56 = vpop.f32.mrb[3].mxu1 }
 0x2e3   : > { %v780_v57 = vmax.f32 %v775_v42, 0.0 }
 0x2e4   : > { %v781_v58 = vpack.c.bf16 %v779_v55, %v779_v55 }
 0x2e5   : > { %v782_v59 = vpack.c.bf16 %v780_v57, %v780_v57 }
 0x2e6   : > { %823 = vrot.lane.b32.xlu0 %v781_v58, %s1163_s30  ;;  %v785_v60 = vsel %vm493_vm11, 0, %v781_v58  ;;  %v797_v61 = vrot.slane %v781_v58, 4  ;;  %v791_v62 = vsel %vm523_vm10, 0, %v781_v58  ;;  %v787_v63 = vsel %vm503_vm2, 0, %v781_v58 }
 0x2e7   : > { %825 = vrot.lane.b32.xlu1 %v782_v59, %s1163_s30  ;;  %v786_v2 = vsel %vm494_vm15, 0, %v782_v59  ;;  %v815_v41 = vrot.slane %v787_v63, 4  ;;  %v789_v4 = vsel %vm513_vm3, 0, %v781_v58  ;;  %v792_v44 = vsel %vm524_vm12, 0, %v782_v59 }
 0x2e8   : > { %v830_v52 = vrot.slane %v789_v4, 4  ;;  %v798_v12 = vrot.slane %v782_v59, 4  ;;  %vm1599_vm10 = vcmp.ne.s16.totalorder %v1277_v28, 0  ;;  %vm1600_vm11 = vcmp.ne.s16.totalorder %v1318_v51, 0 }
 0x2e9   : > { %v788_v27 = vsel %vm1599_vm10, 0, %v782_v59  ;;  %v790_v31 = vsel %vm1600_vm11, 0, %v782_v59  ;;  %vm1601_vm12 = vcmp.ne.s16.totalorder %v1351_v0, 0  ;;  %vm1602_vm15 = vcmp.ne.s16.totalorder %v1356_v1, 0 }
 0x2ea   : > { %807 = vrot.lane.b32.xlu0 %v785_v60, %s1164_s8  ;;  %v816_v13 = vrot.slane %v788_v27, 4  ;;  %v793_v46 = vsel %vm1601_vm12, 0, %v781_v58  ;;  %v831_v14 = vrot.slane %v790_v31, 4  ;;  %v794_v28 = vsel %vm1602_vm15, 0, %v782_v59 }
 0x2eb   : > { %799 = vrot.lane.b32.xlu1 %v797_v61, %s1159_s26  ;;  %vm1603_vm2 = vcmp.ne.s16.totalorder %v1375_v7, 0  ;;  %v783_v29 = vsel %vm469_vm1, 0, %v781_v58  ;;  %vm1606_vm3 = vcmask 769024   ;;  %v896_v58 = vld [vmem:[%s1590_s6] sm:$0xf] }
 0x2ec   : > { %v784_v24 = vsel %vm1603_vm2, 0, %v782_v59 }
 0x2ee   : > { %840 = vrot.lane.b32.xlu0 %v791_v62, %s1167_s11 }
 0x2ef   : > { %809 = vrot.lane.b32.xlu1 %v786_v2, %s1164_s8  ;;  %s295_s8 = scalar_lea.vmem %s1591_s7, %s1113_s28 }
 0x2f2   : > { %817 = vrot.lane.b32.xlu0 %v815_v41, %s1165_s9 }
 0x2f3   : > { %842 = vrot.lane.b32.xlu1 %v792_v44, %s1167_s11 }
 0x2f6   : > { %832 = vrot.lane.b32.xlu0 %v830_v52, %s1166_s10 }
 0x2f7   : > { %801 = vrot.lane.b32.xlu1 %v798_v12, %s1159_s26 }
 0x2fa   : > { %846 = vrot.lane.b32.xlu0 %v797_v61, %s1168_s16 }
 0x2fb   : > { %819 = vrot.lane.b32.xlu1 %v816_v13, %s1165_s9 }
 0x2fe   : > { %854 = vrot.lane.b32.xlu0 %v793_v46, %s1169_s17 }
 0x2ff   : > { %834 = vrot.lane.b32.xlu1 %v831_v14, %s1166_s10 }
 0x303   : > { %848 = vrot.lane.b32.xlu1 %v798_v12, %s1168_s16 }
 0x307   : > { %856 = vrot.lane.b32.xlu1 %v794_v28, %s1169_s17 }
 0x358   : > { %v824_v15 = vpop.permute.xlu0 %823 }
 0x359   : > { %v826_v51 = vpop.permute.xlu1 %825 }
 0x35a   : > { %v827_v48 = vsel %vm467_vm6, %v824_v15, %v826_v51 }
 0x35c   : > { %v808_v16 = vpop.permute.xlu0 %807 }
 0x35d   : > { %v800_v3 = vpop.permute.xlu1 %799  ;;  %v811_v30 = vsel %vm559_vm9, %v1377_v8, %v808_v16 }
 0x35e   : > { %v803_v0 = vsel %vm501_vm14, %v1373_v6, %v800_v3 }
 0x35f   : > { %v861_v17 = vsel %vm624_vm7, 0, %v803_v0 }
 0x360   : > { %914 = vrot.lane.b32.xlu0 %v861_v17, %s1162_s29  ;;  %v841_v18 = vpop.permute.xlu0 %840 }
 0x361   : > { %v810_v19 = vpop.permute.xlu1 %809 }
 0x364   : > { %v818_v20 = vpop.permute.xlu0 %817 }
 0x365   : > { %v843_v21 = vpop.permute.xlu1 %842  ;;  %v821_v26 = vsel %vm572_vm13, %v1379_v9, %v818_v20 }
 0x366   : > { %v870_v34 = vsel %vm624_vm7, %v811_v30, %v821_v26  ;;  %v844_v37 = vsel %vm601_vm8, %v841_v18, %v843_v21  ;;  %v845_v8 = vsel %vm601_vm8, %v843_v21, %v1383_v11  ;;  %v812_v11 = vsel %vm559_vm9, %v808_v16, %v810_v19 }
 0x368   : > { %v833_v22 = vpop.permute.xlu0 %832 }
 0x369   : > { %v802_v1 = vpop.permute.xlu1 %801  ;;  %v879_v23 = vsel %vm624_vm7, %v824_v15, %v833_v22 }
 0x36a   : > { %v804_v25 = vsel %vm501_vm14, %v800_v3, %v802_v1  ;;  %926 = vrot.lane.b32.xlu0 %v879_v23, %s1162_s29  ;;  %v867_v6 = vsel %vm624_vm7, %v784_v24, %v802_v1  ;;  %vm1604_vm14 = vcmask 777216  }
 0x36b   : > { %918 = vrot.lane.b32.xlu1 %v867_v6, %s1162_s29  ;;  %v864_v7 = vsel %vm624_vm7, %v783_v29, %v804_v25  ;;  %vm1605_vm1 = vmmov %vm1604_vm14 }
 0x36c   : > { %v847_v36 = vpop.permute.xlu0 %846 }
 0x36d   : > { %v820_v33 = vpop.permute.xlu1 %819  ;;  %v888_v56 = vsel %vm624_vm7, %v841_v18, %v847_v36 }
 0x36e   : > { %916 = vrot.lane.b32.xlu0 %v864_v7, %s1162_s29  ;;  %v876_v9 = vsel %vm624_vm7, %v810_v19, %v820_v33  ;;  %v822_v45 = vsel %vm572_vm13, %v818_v20, %v820_v33  ;;  %v895_v20 = vld [vmem:[%s1589_s5] sm:$0x3] }
 0x36f   : > { %920 = vrot.lane.b32.xlu1 %v870_v34, %s1162_s29  ;;  %v873_v50 = vsel %vm624_vm7, %v812_v11, %v822_v45 }
 0x370   : > { %v855_v42 = vpop.permute.xlu0 %854 }
 0x371   : > { %v835_v35 = vpop.permute.xlu1 %834 }
 0x372   : > { %924 = vrot.lane.b32.xlu0 %v876_v9, %s1162_s29  ;;  %v836_v47 = vsel %vm590_vm0, %v833_v22, %v835_v35  ;;  %v837_v53 = vsel %vm590_vm0, %v835_v35, %v1381_v10  ;;  %vm1607_vm0 = vmmov %vm1606_vm3 }
 0x373   : > { %v885_v54 = vsel %vm624_vm7, %v826_v51, %v837_v53 }
 0x375   : > { %v849_v32 = vpop.permute.xlu1 %848 }
 0x376   : > { %v850_v38 = vsel %vm1604_vm14, %v847_v36, %v849_v32  ;;  %v851_v39 = vsel %vm1605_vm1, %v849_v32, %v1420_v49  ;;  %v882_v49 = vsel %vm624_vm7, %v827_v48, %v836_v47 }
 0x377   : > { %v891_v40 = vsel %vm624_vm7, %v844_v37, %v850_v38  ;;  %v894_v43 = vsel %vm624_vm7, %v845_v8, %v851_v39 }
 0x378   : > { %934 = vrot.lane.b32.xlu1 %v891_v40, %s1162_s29  ;;  %936 = vrot.lane.b32.xlu0 %v894_v43, %s1162_s29 }
 0x379   : > { %v857_v55 = vpop.permute.xlu1 %856 }
 0x37a   : > { %v859_v57 = vsel %vm1606_vm3, %v857_v55, %v1447_v5  ;;  %v858_v10 = vsel %vm1607_vm0, %v855_v42, %v857_v55 }
 0x37c   : > { %922 = vrot.lane.b32.xlu1 %v873_v50, %s1162_s29  ;;  %928 = vrot.lane.b32.xlu0 %v882_v49, %s1162_s29 }
 0x380   : > { %930 = vrot.lane.b32.xlu1 %v885_v54, %s1162_s29  ;;  %938 = vrot.lane.b32.xlu0 %v855_v42, %s1162_s29 }
 0x384   : > { %932 = vrot.lane.b32.xlu1 %v888_v56, %s1162_s29  ;;  %942 = vrot.lane.b32.xlu0 %v859_v57, %s1162_s29 }
 0x388   : > { %940 = vrot.lane.b32.xlu1 %v858_v10, %s1162_s29 }
 0x38c   : > { %899 = vperm.xlu1 %1136, %v896_v58  }
 0x3d2   : > { %v915_v59 = vpop.permute.xlu0 %914 }
 0x3dc   : > { %v927_v60 = vpop.permute.xlu0 %926 }
 0x3dd   : > { %v919_v61 = vpop.permute.xlu1 %918 }
 0x3e0   : > { %v917_v62 = vpop.permute.xlu0 %916 }
 0x3e1   : > { %v944_v63 = vsel %vm531_vm4, %v915_v59, %v917_v62  ;;  %v945_v5 = vsel %vm531_vm4, %v917_v62, %v919_v61  ;;  %v921_v2 = vpop.permute.xlu1 %920 }
 0x3e2   : > { %971 = vmatprep.subr.bf16.mxu0 %v945_v5 }
 0x3e3   : > { %972 = vmatpush1.bf16.msra.mxu0 %v944_v63 }
 0x3e4   : > { %v925_v41 = vpop.permute.xlu0 %924 }
 0x3ea   : > { %v935_v4 = vpop.permute.xlu1 %934  ;;  %v937_v44 = vpop.permute.xlu0 %936 }
 0x3eb   : > { %v951_v15 = vsel %vm531_vm4, %v935_v4, %v937_v44 }
 0x3ee   : > { %v923_v52 = vpop.permute.xlu1 %922  ;;  %v929_v12 = vpop.permute.xlu0 %928 }
 0x3ef   : > { %v946_v27 = vsel %vm531_vm4, %v921_v2, %v923_v52  ;;  %v947_v13 = vsel %vm531_vm4, %v923_v52, %v925_v41  ;;  %v948_v14 = vsel %vm531_vm4, %v927_v60, %v929_v12 }
 0x3f0   : > { %973 = vmatprep.subr.bf16.mxu0 %v947_v13 }
 0x3f1   : > { %974 = vmatpush1.bf16.msra.mxu0 %v946_v27 }
 0x3f2   : > { %v931_v31 = vpop.permute.xlu1 %930  ;;  %v939_v28 = vpop.permute.xlu0 %938 }
 0x3f3   : > { %v949_v46 = vsel %vm531_vm4, %v929_v12, %v931_v31 }
 0x3f4   : > { %975 = vmatprep.subr.bf16.mxu0 %v949_v46 }
 0x3f5   : > { %976 = vmatpush1.bf16.msra.mxu0 %v948_v14 }
 0x3f6   : > { %v933_v51 = vpop.permute.xlu1 %932  ;;  %977 = vmatprep.subr.bf16.mxu0 %v951_v15  ;;  %v943_v3 = vpop.permute.xlu0 %942 }
 0x3f7   : > { %v950_v16 = vsel %vm531_vm4, %v933_v51, %v935_v4 }
 0x3f9   : > { %978 = vmatpush1.bf16.msra.mxu0 %v950_v16 }
 0x3fa   : > { %v941_v0 = vpop.permute.xlu1 %940 }
 0x3fb   : > { %v952_v17 = vsel %vm531_vm4, %v939_v28, %v941_v0  ;;  %v953_v18 = vsel %vm531_vm4, %v941_v0, %v943_v3 }
 0x3fc   : > { %v966_v19 = vsel %vm624_vm7, %v952_v17, 0  ;;  %1108 = vmatprep.subr.msk.bf16.mxu0 %vm624_vm7, %v953_v18 }
 0x3fd   : > { %980 = vmatpush1.bf16.msra.mxu0 %v966_v19 }
 0x400   : > { %1109 = vmatmul.mubr.msk.bf16.vlgmr.msra.gmra.mrb[4].mxu0 %vm728_vm5, %v895_v20 }
 0x40b   : > { %v900_v21 = vpop.permute.xlu1 %899 }
 0x4d3   : > { %v1005_v22 = vpop.f32.mrb[4].mxu0 }
 0x4d4   : > { %v1006_v1 = vadd.f32 %v1005_v22, %v900_v21  ;;  %v1007_v23 = vpop.f32.mrb[5].mxu0 }
 0x4d5   : > { %v1008_v24 = vadd.f32 %v1007_v23, %v900_v21  ;;  %v1009_v25 = vpop.f32.mrb[6].mxu0 }
 0x4d6   : > { %v1012_v6 = vmax.f32 %v1006_v1, 0.0  ;;  %v1010_v26 = vpop.f32.mrb[7].mxu0 }
 0x4d7   : > { %v1013_v29 = vmax.f32 %v1008_v24, 0.0 }
 0x4d9   : > { %v1016_v30 = vcombine.low %v1012_v6, %v1013_v29 }
 0x4db   : > { %1018 = vst [vmem:[%s295_s8] sm:$0xff] %v1016_v30 }
 0x4dc PF: > { %s17_s24 = sadd.s32 1, %s1155_s24  }
 0x4dd   : > { %p14_p4 = scmp.ge.s32.totalorder %s17_s24, 4  }
 0x4df   :  { %16 = sbr.rel (!%p14_p4) target bundleno = 1 (0x1), region = 81 }

</bundles_post_ra>
